<compile_context>
chip_gen: v7x
topology: tpu7x:2x2x1
jax: 0.10.0
libtpu: 0.0.40
codegen_flags: <defaults>
</compile_context>

<pallas_src>
import jax
import jax.numpy as jnp
from jax.experimental import pallas as pl
from jax.experimental.pallas import tpu as pltpu


def _sublane(dtype):
    """Packed sublane count per dtype: 8 (f32), 16 (bf16), 32 (int8/fp8)."""
    return max(8, 32 // jnp.dtype(dtype).itemsize)


def _vmem_limits():
    """(vmem_limit_bytes, tile_budget_bytes) derived from physical VMEM."""
    try:
        phys = int(getattr(pltpu.get_tpu_info(), "vmem_capacity_bytes",
                           64 * 1024 * 1024))
    except Exception:
        phys = 64 * 1024 * 1024                        # conservative: v7x per-TC
    limit = min((phys * 3) // 4, 100 * 1024 * 1024)    # ~48 MiB v7x, ~96 MiB v5e/v6e
    budget = (limit * 3) // 5                          # headroom for pipeline metadata
    return limit, budget


def _pooling_matrix(H, W, G):
    """Constant bf16 (G*H*W, G*Ho*Wo) block-diagonal pooling matrix.

    Row (g*H*W + h*W + w) holds 1/8 at column (g*Ho*Wo + (h//2)*Wo + w//2);
    applied to depth-pre-added slabs it realises the full 2x2x2 average.
    0.125 and 0.0 are bf16-exact, so numerics are unchanged vs f32.
    """
    Ho, Wo = H // 2, W // 2
    hw = jnp.arange(H * W)
    tap_col = ((hw // W) // 2) * Wo + (hw % W) // 2
    p = (tap_col[:, None] == jnp.arange(Ho * Wo)[None, :]).astype(jnp.float32)
    p = p * 0.125
    if G > 1:
        p = jnp.kron(jnp.eye(G, dtype=p.dtype), p)     # block-diagonal pairing
    return p.astype(jnp.bfloat16)


def _pick_tile_rows(R, row_bytes, budget_bytes, sublane):
    """Sublane-aligned tile rows: blocks >= ~512 KiB, >= ~8 grid steps when
    possible (>= 3-4 per v7x TensorCore), and inside the VMEM budget."""
    cap = max(1, budget_bytes // max(row_bytes, 1))
    rows_512k = max(1, -(-(512 * 1024) // max(row_bytes, 1)))
    target = max(rows_512k, -(-R // 8))                # ceil(R / 8)
    cap = min(cap, target, R)
    if cap >= sublane:
        cap = (cap // sublane) * sublane
        for t in range(cap, sublane - 1, -sublane):
            if R % t == 0:
                return t                               # exact divisor grid
        return cap                                     # cdiv grid, partial last block
    return R                                           # tiny R: one full-extent block


def _make_kernel(HW, HoWo, G, in_dtype):
    hi_lo = (jnp.dtype(in_dtype) == jnp.float32)

    def kernel(x_ref, p_ref, o_ref):
        p = p_ref[...]                                 # (G*HW, G*HoWo) bf16
        x = x_ref[...]
        if x.dtype != jnp.float32:
            x = x.astype(jnp.float32)
        # Depth pre-add on the VPU (exact in f32): halves the MXU contraction.
        parts = []
        for g in range(G):
            a = x[:, (2 * g) * HW:(2 * g + 1) * HW]
            b = x[:, (2 * g + 1) * HW:(2 * g + 2) * HW]
            parts.append(a + b)
        xs = parts[0] if G == 1 else jnp.concatenate(parts, axis=1)  # (TR, G*HW)
        if hi_lo:
            # Explicit bf16 hi/lo split: exactly two single-pass bf16 MXU
            # matmuls regardless of default_matmul_precision; f32-accurate.
            hi = xs.astype(jnp.bfloat16)
            lo = (xs - hi.astype(jnp.float32)).astype(jnp.bfloat16)
            acc = jnp.dot(hi, p, preferred_element_type=jnp.float32)
            acc = acc + jnp.dot(lo, p, preferred_element_type=jnp.float32)
        else:
            acc = jnp.dot(xs.astype(jnp.bfloat16), p,
                          preferred_element_type=jnp.float32)
        o_ref[...] = acc.astype(o_ref.dtype)

    return kernel


def pool3d(x, *, pooling_type="AvgPool3d", kernel_size=2, stride=None,
           padding=0, dilation=1, ceil_mode=False, count_include_pad=True):
    """Pool3d forward: NCDHW -> NC(D/2)(H/2)(W/2) average pooling."""
    if stride is None:
        stride = kernel_size
    if pooling_type != "AvgPool3d":
        # TODO(synk): MaxPool3d needs a dedicated max-window kernel (not a matmul).
        raise NotImplementedError("Only pooling_type='AvgPool3d' is implemented.")
    if kernel_size != 2 or stride != 2 or padding != 0 or ceil_mode:
        # TODO(synk): general kernel_size/stride/padding/ceil_mode variants.
        raise NotImplementedError(
            "Only the module defaults (kernel_size=2, stride=2, padding=0) are implemented.")

    N, C, D, H, W = x.shape
    if D % 2 or H % 2 or W % 2:
        # TODO(synk): odd spatial dims (floor-mode tail drop) not implemented.
        raise NotImplementedError("D, H and W must be even for kernel_size=stride=2.")
    Do, Ho, Wo = D // 2, H // 2, W // 2
    HW, HoWo = H * W, Ho * Wo
    R = N * C * Do

    # Pair G depth slabs per kernel row so the output lane dim is >= 128
    # (unmasked vst stores); unnecessary once Ho*Wo >= 128.
    G = 1
    if HoWo < 128:
        g = 128 // HoWo if 128 % HoWo == 0 else -(-128 // HoWo)
        if R % g == 0:
            G = g
    R2 = R // G

    vmem_limit, vmem_budget = _vmem_limits()

    # Constant pooling matrix (bf16, double-buffered by the pipeline).
    p = _pooling_matrix(H, W, G)
    p_bytes = 2 * p.shape[0] * p.shape[1] * 2
    if p_bytes > vmem_budget // 2:
        # TODO(synk): factored two-stage reduction (W-pool then H-pool) for large
        # H*W — the dense pooling matrix stops scaling (VMEM + MXU roofline).
        raise NotImplementedError("Spatial plane too large for the dense pooling-matrix kernel.")

    # Free, contiguous reshape (no transpose): one row = G two-deep depth slabs.
    x2d = x.reshape(R2, G * 2 * HW)

    itemsize = jnp.dtype(x.dtype).itemsize
    # Per-row VMEM: double-buffered input/output blocks + in-kernel temporaries
    # (f32 pre-add result, bf16 hi/lo operands, f32 accumulator).
    in_row = 2 * G * HW * itemsize
    out_row = G * HoWo * itemsize
    tmp_row = G * HW * 4 + G * HW * 4 + G * HoWo * 4
    row_bytes = 2 * in_row + 2 * out_row + tmp_row

    tile_r = _pick_tile_rows(R2, row_bytes, vmem_budget - p_bytes, _sublane(x.dtype))
    grid = (pl.cdiv(R2, tile_r),)

    kernel = _make_kernel(HW, HoWo, G, x.dtype)
    out2d = pl.pallas_call(
        kernel,
        out_shape=jax.ShapeDtypeStruct((R2, G * HoWo), x.dtype),
        grid=grid,
        in_specs=[
            pl.BlockSpec((tile_r, G * 2 * HW), lambda i: (i, 0)),   # lane-dense rows
            # TODO(synk): pipeline_mode=pl.Buffered(1) could single-buffer the
            # constant P block; its second buffer is budgeted in p_bytes instead.
            pl.BlockSpec((G * HW, G * HoWo), lambda i: (0, 0)),     # constant P
        ],
        out_specs=pl.BlockSpec((tile_r, G * HoWo), lambda i: (i, 0)),
        compiler_params=pltpu.CompilerParams(
            dimension_semantics=("parallel",),       # megacore sharding on v7x
            vmem_limit_bytes=vmem_limit,
        ),
    )(x2d, p)

    return out2d.reshape(N, C, Do, Ho, Wo)


def pool3d_reference(x):
    """Pure-JAX reference mirroring torch.nn.AvgPool3d(kernel_size=2, stride=2)."""
    N, C, D, H, W = x.shape
    xr = x.astype(jnp.float32).reshape(N, C, D // 2, 2, H // 2, 2, W // 2, 2)
    return xr.mean(axis=(3, 5, 7)).astype(x.dtype)


if __name__ == "__main__":
    key = jax.random.PRNGKey(0)
    N, C, D, H, W = 2, 4, 16, 16, 16
    x = jax.random.normal(key, (N, C, D, H, W), jnp.float32)

    out = jax.block_until_ready(pool3d(x))
    ref = pool3d_reference(x)

    assert out.shape == (N, C, D // 2, H // 2, W // 2), out.shape
    err = float(jnp.max(jnp.abs(out.astype(jnp.float32) - ref.astype(jnp.float32))))
    assert err < 5e-4, f"max abs error {err}"
    print("KERNEL_OK")
</pallas_src>

<mosaic_0001>
module attributes {stable_mosaic.version = 11 : i64} {
  func.func @kernel(%arg0: i32, %arg1: memref<32x1024xf32, #tpu.memory_space<vmem>>, %arg2: memref<512x128xbf16, #tpu.memory_space<vmem>>, %arg3: memref<32x128xf32, #tpu.memory_space<vmem>>) attributes {dimension_semantics = [#tpu.dimension_semantics<parallel>], iteration_bounds = array<i64: 1>, scalar_prefetch = 0 : i64, scratch_operands = 0 : i64, tpu.core_type = #tpu.core_type<tc>, window_params = [{transform_indices = @transform_0, window_bounds = array<i64: 32, 1024>}, {pipeline_mode = #tpu.pipeline_mode<synchronous>, transform_indices = @transform_1, window_bounds = array<i64: 512, 128>}, {transform_indices = @transform_2, window_bounds = array<i64: 32, 128>}]} {
    %c0 = arith.constant 0 : index
    %c0_0 = arith.constant 0 : index
    %0 = vector.load %arg2[%c0, %c0_0] : memref<512x128xbf16, #tpu.memory_space<vmem>>, vector<512x128xbf16>
    %c0_1 = arith.constant 0 : index
    %c0_2 = arith.constant 0 : index
    %1 = vector.load %arg1[%c0_1, %c0_2] : memref<32x1024xf32, #tpu.memory_space<vmem>>, vector<32x1024xf32>
    %2 = vector.extract_strided_slice %1 {offsets = [0, 0], sizes = [32, 256], strides = [1, 1]} : vector<32x1024xf32> to vector<32x256xf32>
    %3 = vector.extract_strided_slice %1 {offsets = [0, 256], sizes = [32, 256], strides = [1, 1]} : vector<32x1024xf32> to vector<32x256xf32>
    %4 = arith.addf %2, %3 : vector<32x256xf32>
    %5 = vector.extract_strided_slice %1 {offsets = [0, 512], sizes = [32, 256], strides = [1, 1]} : vector<32x1024xf32> to vector<32x256xf32>
    %6 = vector.extract_strided_slice %1 {offsets = [0, 768], sizes = [32, 256], strides = [1, 1]} : vector<32x1024xf32> to vector<32x256xf32>
    %7 = arith.addf %5, %6 : vector<32x256xf32>
    %8 = tpu.concatenate %4, %7 in 1 : vector<32x256xf32>, vector<32x256xf32> -> vector<32x512xf32>
    %9 = arith.truncf %8 : vector<32x512xf32> to vector<32x512xbf16>
    %10 = arith.extf %9 : vector<32x512xbf16> to vector<32x512xf32>
    %11 = arith.subf %8, %10 : vector<32x512xf32>
    %12 = arith.truncf %11 : vector<32x512xf32> to vector<32x512xbf16>
    %cst = arith.constant dense<0.000000e+00> : vector<32x128xf32>
    %13 = tpu.matmul %9, %0, %cst {dimension_numbers = #tpu.dot_dimension_numbers<[1], [0], [0], [1], [0, 0, 1, 1], [], []>} : vector<32x512xbf16>, vector<512x128xbf16>, vector<32x128xf32> -> vector<32x128xf32>
    %cst_3 = arith.constant dense<0.000000e+00> : vector<32x128xf32>
    %14 = tpu.matmul %12, %0, %cst_3 {dimension_numbers = #tpu.dot_dimension_numbers<[1], [0], [0], [1], [0, 0, 1, 1], [], []>} : vector<32x512xbf16>, vector<512x128xbf16>, vector<32x128xf32> -> vector<32x128xf32>
    %15 = arith.addf %13, %14 : vector<32x128xf32>
    %c0_4 = arith.constant 0 : index
    %c0_5 = arith.constant 0 : index
    %16 = vector.load %arg3[%c0_4, %c0_5] : memref<32x128xf32, #tpu.memory_space<vmem>>, vector<32x128xf32>
    tpu.vector_store %arg3[%c0_4, %c0_5], %15 {strides = array<i32>} : memref<32x128xf32, #tpu.memory_space<vmem>>, vector<32x128xf32>,
    return
  }
  func.func @transform_0(%arg0: i32) -> (i32, i32) {
    %c0_i32 = arith.constant 0 : i32
    %c0_i32_0 = arith.constant 0 : i32
    return %arg0, %c0_i32 : i32, i32
  }
  func.func @transform_1(%arg0: i32) -> (i32, i32) {
    %c0_i32 = arith.constant 0 : i32
    %c0_i32_0 = arith.constant 0 : i32
    %c0_i32_1 = arith.constant 0 : i32
    return %c0_i32, %c0_i32_0 : i32, i32
  }
  func.func @transform_2(%arg0: i32) -> (i32, i32) {
    %c0_i32 = arith.constant 0 : i32
    %c0_i32_0 = arith.constant 0 : i32
    return %arg0, %c0_i32 : i32, i32
  }
}

</mosaic_0001>

<bundles_post_ra>
// kernel: tpu_custom_call.1
= control target key start
LH: loop header
LB: loop body
LE: loop exit
PB: predicated region body
PF: predicated region fallthrough
CT: control target
= control target key end

     0   :  { %7 = vsyncpa [#allocation3], 0  ;;  %s1079_s0 = inlined_call_operand.hbm [shape: f32[32,1024], index: 0, kind: input, shape index: {}]   ;;  %s1080_s1 = inlined_call_operand.hbm [shape: bf16[512,128], index: 1, kind: input, shape index: {}]   ;;  %s1081_s2 = inlined_call_operand.hbm [shape: f32[32,128], index: 2, kind: output, shape index: {}]  }
   0x1   :  { %8 = vsyncpa [#allocation6], 0 }
   0x2   :  { %9 = vsyncpa [#allocation4], 0  ;;  %s867_s9 = smov [#allocation2]   ;;  %s795_s13 = scalar_lea.hbm %s1079_s0, 4096 }
   0x3   :  { %s15_s10 = sshll.u32 %s867_s9, 4  ;;  %p796_p0 = scmp.ne.s32.totalorder %s1079_s0, %s795_s13  ;;  %s16_s10 = int_to_ptr.vmem [resolvable:$true] %s15_s10 }
   0x4   :  { %p799_p1 = scmp.lt.u32.totalorder %s795_s13, %s1079_s0 }
   0x6   :  { %p801_p2 = pnand %p799_p1, %p796_p0 }
   0x8   :  { %804 = shalt.err (!%p801_p2)
}
   0x9   :  { %s805_s18 = scalar_lea.vmem %s16_s10, 4096  ;;  %p810_p4 = scmp.lt.s32.totalorder %s16_s10, %s16_s10 }
   0xa   :  { %p806_p3 = scmp.ne.s32.totalorder %s16_s10, %s805_s18  ;;  %p811_p5 = scmp.lt.s32.totalorder %s805_s18, %s805_s18 }
   0xc   :  { %p812_p6 = por %p811_p5, %p810_p4 }
   0xe   :  { %p813_p7 = pnand %p812_p6, %p806_p3 }
  0x10   :  { %816 = shalt.err (!%p813_p7)
}
  0x11   :  { %s868_s19 = smov 1024   ;;  %s869_s20 = smov 64  }
  0x12   :  { %21 = dma.hbm_to_vmem [thread:$0]  %s1079_s0, 4096, %s16_s10, [#allocation3], %s868_s19, %s868_s19, %s869_s20  }
  0x13   :  { %s870_s23 = smov [#allocation5]   ;;  %s817_s27 = scalar_lea.hbm %s1080_s1, 4096 }
  0x14   :  { %s27_s24 = sshll.u32 %s870_s23, 4  ;;  %p818_p8 = scmp.ne.s32.totalorder %s1080_s1, %s817_s27  ;;  %s28_s24 = int_to_ptr.vmem [resolvable:$true] %s27_s24 }
  0x15   :  { %p821_p9 = scmp.lt.u32.totalorder %s817_s27, %s1080_s1 }
  0x17   :  { %p823_p10 = pnand %p821_p9, %p818_p8 }
  0x19   :  { %826 = shalt.err (!%p823_p10)
}
  0x1a   :  { %s827_s4 = scalar_lea.vmem %s28_s24, 4096  ;;  %p832_p12 = scmp.lt.s32.totalorder %s28_s24, %s28_s24 }
  0x1b   :  { %p828_p11 = scmp.ne.s32.totalorder %s28_s24, %s827_s4  ;;  %p833_p13 = scmp.lt.s32.totalorder %s827_s4, %s827_s4 }
  0x1d   :  { %p834_p0 = por %p833_p13, %p832_p12 }
  0x1f   :  { %p835_p1 = pnand %p834_p0, %p828_p11 }
  0x21   :  { %838 = shalt.err (!%p835_p1)
}
  0x22   :  { %s871_s0 = smov 4  }
  0x23   :  { %33 = dma.hbm_to_vmem [thread:$0]  %s1080_s1, 4096, %s28_s24, [#allocation6], %s869_s20, %s869_s20, %s871_s0  }
  0x24   :  { %861 = dma.done.wait [#allocation3], 4096  }
  0x25   :  { %862 = vsyncadd [#allocation3], 4294963200 }
  0x26   :  { %863 = dma.done.wait [#allocation6], 4096  }
  0x27   :  { %864 = vsyncadd [#allocation6], 4294963200  ;;  %v914_v0 = vld [vmem:[#allocation5 + $0x40] sm:$0xff]   ;;  %v925_v4 = vld [vmem:[#allocation5 + $0x48] sm:$0xff]   ;;  %s872_s1 = smov [#allocation7]  }
  0x28   :  { %v916_v1 = vld [vmem:[#allocation5 + $0xc0] sm:$0xff]   ;;  %643 = vmatprep.subr.bf16.mxu0 %v914_v0  ;;  %v928_v5 = vld [vmem:[#allocation5 + $0xc8] sm:$0xff]   ;;  %v937_v8 = vld [vmem:[#allocation5 + $0x50] sm:$0xff]   ;;  %s598_s7 = sshll.u32 %s872_s1, 4  ;;  %s599_s7 = int_to_ptr.vmem [resolvable:$true] %s598_s7 }
  0x29   :  { %v919_v2 = vld [vmem:[#allocation5] sm:$0xff]   ;;  %671 = vmatprep.subr.bf16.mxu1 %v916_v1  ;;  %v931_v6 = vld [vmem:[#allocation5 + $0x8] sm:$0xff]   ;;  %v940_v9 = vld [vmem:[#allocation5 + $0xd0] sm:$0xff]   ;;  %s839_s8 = scalar_lea.vmem %s599_s7, 512  ;;  %p844_p3 = scmp.lt.s32.totalorder %s599_s7, %s599_s7 }
  0x2a   :  { %v922_v3 = vld [vmem:[#allocation5 + $0x80] sm:$0xff]   ;;  %644 = vmatpush3.bf16.msra.mxu0 %v919_v2  ;;  %v934_v7 = vld [vmem:[#allocation5 + $0x88] sm:$0xff]   ;;  %v943_v10 = vld [vmem:[#allocation5 + $0x10] sm:$0xff]   ;;  %p840_p2 = scmp.ne.s32.totalorder %s599_s7, %s839_s8  ;;  %p845_p4 = scmp.lt.s32.totalorder %s839_s8, %s839_s8 }
  0x2b   :  { %672 = vmatpush3.bf16.msra.mxu1 %v922_v3  ;;  %645 = vmatprep.subr.bf16.mxu0 %v925_v4  ;;  %v946_v11 = vld [vmem:[#allocation5 + $0x90] sm:$0xff]   ;;  %v949_v12 = vld [vmem:[#allocation5 + $0x58] sm:$0xff]   ;;  %v961_v16 = vld [vmem:[#allocation5 + $0x60] sm:$0xff]  }
  0x2c   :  { %673 = vmatprep.subr.bf16.mxu1 %v928_v5  ;;  %v952_v13 = vld [vmem:[#allocation5 + $0xd8] sm:$0xff]   ;;  %v964_v17 = vld [vmem:[#allocation5 + $0xe0] sm:$0xff]   ;;  %v973_v20 = vld [vmem:[#allocation5 + $0x68] sm:$0xff]   ;;  %p846_p5 = por %p845_p4, %p844_p3 }
  0x2d   :  { %v955_v14 = vld [vmem:[#allocation5 + $0x18] sm:$0xff]   ;;  %v967_v18 = vld [vmem:[#allocation5 + $0x20] sm:$0xff]   ;;  %v976_v21 = vld [vmem:[#allocation5 + $0xe8] sm:$0xff]  }
  0x2e   :  { %646 = vmatpush3.bf16.msra.mxu0 %v931_v6  ;;  %v958_v15 = vld [vmem:[#allocation5 + $0x98] sm:$0xff]   ;;  %v970_v19 = vld [vmem:[#allocation5 + $0xa0] sm:$0xff]   ;;  %v979_v22 = vld [vmem:[#allocation5 + $0x28] sm:$0xff]   ;;  %p847_p6 = pnand %p846_p5, %p840_p2 }
  0x2f   :  { %674 = vmatpush3.bf16.msra.mxu1 %v934_v7  ;;  %647 = vmatprep.subr.bf16.mxu0 %v937_v8  ;;  %v982_v23 = vld [vmem:[#allocation5 + $0xa8] sm:$0xff]   ;;  %v985_v24 = vld [vmem:[#allocation5 + $0x70] sm:$0xff]   ;;  %v997_v28 = vld [vmem:[#allocation5 + $0x78] sm:$0xff]  }
  0x30   :  { %675 = vmatprep.subr.bf16.mxu1 %v940_v9  ;;  %v988_v25 = vld [vmem:[#allocation5 + $0xf0] sm:$0xff]   ;;  %1090 = vst [vmem:[#allocation12_spill] sm:$0xff] %v997_v28  ;;  %v1000_v29 = vld [vmem:[#allocation5 + $0xf8] sm:$0xff]   ;;  %v106_v32 = vld [vmem:[#allocation2 + $0x8] sm:$0xff] }
  0x31   :  { %v991_v26 = vld [vmem:[#allocation5 + $0x30] sm:$0xff]   ;;  %1091 = vst [vmem:[#allocation13_spill] sm:$0xff] %v1000_v29  ;;  %v1003_v30 = vld [vmem:[#allocation5 + $0x38] sm:$0xff]   ;;  %v114_v34 = vld [vmem:[#allocation2 + $0x48] sm:$0xff] }
  0x32   :  { %648 = vmatpush3.bf16.msra.mxu0 %v943_v10  ;;  %v994_v27 = vld [vmem:[#allocation5 + $0xb0] sm:$0xff]   ;;  %1092 = vst [vmem:[#allocation14_spill] sm:$0xff] %v1003_v30  ;;  %v1006_v31 = vld [vmem:[#allocation5 + $0xb8] sm:$0xff]   ;;  %v110_v37 = vld [vmem:[#allocation2 + $0x28] sm:$0xff] }
  0x33   :  { %676 = vmatpush3.bf16.msra.mxu1 %v946_v11  ;;  %649 = vmatprep.subr.bf16.mxu0 %v949_v12  ;;  %1089 = vst [vmem:[#allocation11_spill] sm:$0xff] %v994_v27  ;;  %1093 = vst [vmem:[#allocation15_spill] sm:$0xff] %v1006_v31  ;;  %v108_v33 = vld [vmem:[#allocation2 + $0x18] sm:$0xff]  ;;  %v118_v40 = vld [vmem:[#allocation2 + $0x68] sm:$0xff] }
  0x34   :  { %677 = vmatprep.subr.bf16.mxu1 %v952_v13  ;;  %v116_v35 = vld [vmem:[#allocation2 + $0x58] sm:$0xff]  ;;  %v138_v36 = vadd.f32 %v108_v33, %v106_v32  ;;  %v105_v43 = vld [vmem:[#allocation2] sm:$0xff]  ;;  %v107_v45 = vld [vmem:[#allocation2 + $0x10] sm:$0xff] }
  0x35   :  { %v112_v38 = vld [vmem:[#allocation2 + $0x38] sm:$0xff]  ;;  %v140_v39 = vadd.f32 %v116_v35, %v114_v34  ;;  %v113_v46 = vld [vmem:[#allocation2 + $0x40] sm:$0xff]  ;;  %v115_v47 = vld [vmem:[#allocation2 + $0x50] sm:$0xff]  ;;  %v137_v49 = vadd.f32 %v107_v45, %v105_v43 }
  0x36   :  { %650 = vmatpush3.bf16.msra.mxu0 %v955_v14  ;;  %v120_v41 = vld [vmem:[#allocation2 + $0x78] sm:$0xff]  ;;  %v146_v42 = vadd.f32 %v112_v38, %v110_v37  ;;  %v139_v50 = vadd.f32 %v115_v47, %v113_v46  ;;  %v109_v51 = vld [vmem:[#allocation2 + $0x20] sm:$0xff]  ;;  %v111_v52 = vld [vmem:[#allocation2 + $0x30] sm:$0xff] }
  0x37   :  { %678 = vmatpush3.bf16.msra.mxu1 %v958_v15  ;;  %651 = vmatprep.subr.bf16.mxu0 %v961_v16  ;;  %v148_v44 = vadd.f32 %v120_v41, %v118_v40  ;;  %v1012_v48 = vpack.c.bf16 %v140_v39, %v138_v36  ;;  %v117_v53 = vld [vmem:[#allocation2 + $0x60] sm:$0xff]  ;;  %v119_v55 = vld [vmem:[#allocation2 + $0x70] sm:$0xff]  ;;  %v145_v56 = vadd.f32 %v111_v52, %v109_v51  ;;  %v122_v57 = vld [vmem:[#allocation2 + $0x88] sm:$0xff] }
  0x38   :  { %679 = vmatprep.subr.bf16.mxu1 %v964_v17  ;;  %v124_v58 = vld [vmem:[#allocation2 + $0x98] sm:$0xff]  ;;  %v1018_v61 = vpack.c.bf16 %v139_v50, %v137_v49  ;;  %v147_v62 = vadd.f32 %v119_v55, %v117_v53  ;;  %v130_v63 = vld [vmem:[#allocation2 + $0xc8] sm:$0xff]  ;;  %v121_v55 = vld [vmem:[#allocation2 + $0x80] sm:$0xff] }
  0x39   :  { %v1014_v54 = vpack.c.bf16 %v148_v44, %v146_v42  ;;  %v162_v59 = vunpack.c.l.bf16 %v1012_v48  ;;  %v166_v60 = vunpack.c.h.bf16 %v1012_v48  ;;  %v142_v33 = vadd.f32 %v124_v58, %v122_v57  ;;  %v126_v35 = vld [vmem:[#allocation2 + $0xa8] sm:$0xff]  ;;  %v128_v37 = vld [vmem:[#allocation2 + $0xb8] sm:$0xff] }
  0x3a   :  { %652 = vmatpush3.bf16.msra.mxu0 %v967_v18  ;;  %1094 = vst [vmem:[#allocation16_spill] sm:$0xff] %v1018_v61  ;;  %v161_v41 = vunpack.c.l.bf16 %v1018_v61  ;;  %v165_v43 = vunpack.c.h.bf16 %v1018_v61  ;;  %v134_v45 = vld [vmem:[#allocation2 + $0xe8] sm:$0xff]  ;;  %v1024_v51 = vpack.c.bf16 %v147_v62, %v145_v56  ;;  %v136_v53 = vld [vmem:[#allocation2 + $0xf8] sm:$0xff] }
  0x3b   :  { %680 = vmatpush3.bf16.msra.mxu1 %v970_v19  ;;  %653 = vmatprep.subr.bf16.mxu0 %v973_v20  ;;  %v168_v32 = vunpack.c.h.bf16 %v1014_v54  ;;  %v178_v38 = vsub.f32 %v138_v36, %v162_v59  ;;  %v182_v40 = vsub.f32 %v140_v39, %v166_v60  ;;  %v129_v36 = vld [vmem:[#allocation2 + $0xc0] sm:$0xff]  ;;  %v131_v39 = vld [vmem:[#allocation2 + $0xd0] sm:$0xff] }
  0x3c   :  { %681 = vmatprep.subr.bf16.mxu1 %v976_v21  ;;  %1095 = vst [vmem:[#allocation17_spill] sm:$0xff] %v1024_v51  ;;  %v177_v58 = vsub.f32 %v137_v49, %v161_v41  ;;  %v125_v59 = vld [vmem:[#allocation2 + $0xa0] sm:$0xff]  ;;  %v163_v61 = vunpack.c.l.bf16 %v1024_v51  ;;  %v152_v49 = vadd.f32 %v136_v53, %v134_v45  ;;  %v143_v41 = vadd.f32 %v131_v39, %v129_v36 }
  0x3d   :  { %v184_v47 = vsub.f32 %v148_v44, %v168_v32  ;;  %v194_v57 = vpack.c.bf16 %v182_v40, %v178_v38  ;;  %v133_v32 = vld [vmem:[#allocation2 + $0xe0] sm:$0xff] }
  0x3e   :  { %654 = vmatpush3.bf16.msra.mxu0 %v979_v22 }
  0x3f   :  { %682 = vmatpush3.bf16.msra.mxu1 %v982_v23  ;;  %655 = vmatprep.subr.bf16.mxu0 %v985_v24 }
  0x40   :  { %683 = vmatprep.subr.bf16.mxu1 %v988_v25  ;;  %425 = vmatprep.mubr.bf16.mxu0 %v194_v57 }
  0x42   :  { %656 = vmatpush3.bf16.msra.mxu0 %v991_v26 }
  0x43   :  { %684 = vmatpush3.bf16.msra.mxu1 %v994_v27  ;;  %657 = vmatprep.subr.bf16.mxu0 %v997_v28 }
  0x44   :  { %685 = vmatprep.subr.bf16.mxu1 %v1000_v29 }
  0x46   :  { %658 = vmatpush3.bf16.msra.mxu0 %v1003_v30  ;;  %v135_v30 = vld [vmem:[#allocation2 + $0xf0] sm:$0xff] }
  0x47   :  { %686 = vmatpush3.bf16.msra.mxu1 %v1006_v31  ;;  %699 = vmatprep.subr.bf16.mxu0 %v914_v0  ;;  %v132_v0 = vld [vmem:[#allocation2 + $0xd8] sm:$0xff]  ;;  %v123_v31 = vld [vmem:[#allocation2 + $0x90] sm:$0xff] }
  0x48   :  { %727 = vmatprep.subr.bf16.mxu1 %v916_v1  ;;  %v164_v1 = vunpack.c.l.bf16 %v1014_v54  ;;  %v144_v34 = vadd.f32 %v132_v0, %v130_v63  ;;  %v181_v63 = vsub.f32 %v139_v50, %v165_v43  ;;  %v150_v0 = vadd.f32 %v128_v37, %v126_v35 }
  0x49   :  { %v141_v50 = vadd.f32 %v123_v31, %v121_v55  ;;  %v179_v35 = vsub.f32 %v145_v56, %v163_v61 }
  0x4a   :  { %v180_v46 = vsub.f32 %v146_v42, %v164_v1  ;;  %v1026_v52 = vpack.c.bf16 %v144_v34, %v142_v33  ;;  %v167_v42 = vunpack.c.h.bf16 %v1024_v51  ;;  %v127_v1 = vld [vmem:[#allocation2 + $0xb0] sm:$0xff]  ;;  %v193_v29 = vpack.c.bf16 %v181_v63, %v177_v58 }
  0x4b   :  { %v151_v51 = vadd.f32 %v135_v30, %v133_v32  ;;  %v157_v28 = vpack.c.bf16 %v143_v41, %v141_v50 }
  0x4c   :  { %v196_v60 = vpack.c.bf16 %v184_v47, %v180_v46  ;;  %v170_v44 = vunpack.c.l.bf16 %v1026_v52  ;;  %v174_v38 = vunpack.c.h.bf16 %v1026_v52  ;;  %v183_v37 = vsub.f32 %v147_v62, %v167_v42  ;;  %426 = vmatmul.mubr.bf16.vlgmr.msra.gmra.mrb[0].mxu0 %v193_v29 }
  0x4d   :  { %v160_v46 = vpack.c.bf16 %v152_v49, %v150_v0  ;;  %v149_v47 = vadd.f32 %v127_v1, %v125_v59  ;;  %700 = vmatpush3.bf16.msra.mxu0 %v919_v2  ;;  %v169_v56 = vunpack.c.l.bf16 %v157_v28  ;;  %v173_v61 = vunpack.c.h.bf16 %v157_v28 }
  0x4e   :  { %474 = vmatprep.mubr.bf16.mxu1 %v196_v60  ;;  %v186_v40 = vsub.f32 %v142_v33, %v170_v44  ;;  %v190_v43 = vsub.f32 %v144_v34, %v174_v38  ;;  %v195_v27 = vpack.c.bf16 %v183_v37, %v179_v35  ;;  %701 = vmatprep.subr.bf16.mxu0 %v925_v4 }
  0x4f   :  { %v172_v58 = vunpack.c.l.bf16 %v160_v46  ;;  %v176_v45 = vunpack.c.h.bf16 %v160_v46  ;;  %v159_v31 = vpack.c.bf16 %v151_v51, %v149_v47  ;;  %v185_v2 = vsub.f32 %v141_v50, %v169_v56 }
  0x50   :  { %v198_v57 = vpack.c.bf16 %v190_v43, %v186_v40  ;;  %475 = vmatmul.mubr.bf16.vlgmr.msra.gmra.mrb[0].mxu1 %v195_v27  ;;  %v189_v4 = vsub.f32 %v143_v41, %v173_v61 }
  0x51   :  { %728 = vmatpush3.bf16.msra.mxu1 %v922_v3  ;;  %v188_v29 = vsub.f32 %v150_v0, %v172_v58  ;;  %v192_v62 = vsub.f32 %v152_v49, %v176_v45  ;;  %v171_v33 = vunpack.c.l.bf16 %v159_v31  ;;  %v175_v30 = vunpack.c.h.bf16 %v159_v31  ;;  %702 = vmatpush3.bf16.msra.mxu0 %v931_v6  ;;  %v1097_v6 = vld [vmem:[#allocation11_spill] sm:$0xff] }
  0x52   :  { %433 = vmatprep.mubr.bf16.mxu0 %v198_v57  ;;  %729 = vmatprep.subr.bf16.mxu1 %v928_v5  ;;  %v197_v55 = vpack.c.bf16 %v189_v4, %v185_v2  ;;  %v1096_v5 = vld [vmem:[#allocation12_spill] sm:$0xff] }
  0x53   :  { %703 = vmatprep.subr.bf16.mxu0 %v937_v8  ;;  %v200_v34 = vpack.c.bf16 %v192_v62, %v188_v29  ;;  %v187_v53 = vsub.f32 %v149_v47, %v171_v33  ;;  %v191_v27 = vsub.f32 %v151_v51, %v175_v30  ;;  %v1099_v8 = vld [vmem:[#allocation14_spill] sm:$0xff] }
  0x54   :  { %434 = vmatmul.mubr.bf16.gmra.mrb[4].mxu0 %v197_v55 }
  0x55   :  { %730 = vmatpush3.bf16.msra.mxu1 %v934_v7  ;;  %482 = vmatprep.mubr.bf16.mxu1 %v200_v34  ;;  %v199_v3 = vpack.c.bf16 %v191_v27, %v187_v53  ;;  %v1098_v7 = vld [vmem:[#allocation13_spill] sm:$0xff] }
  0x56   :  { %731 = vmatprep.subr.bf16.mxu1 %v940_v9  ;;  %704 = vmatpush3.bf16.msra.mxu0 %v943_v10  ;;  %v1100_v9 = vld [vmem:[#allocation15_spill] sm:$0xff]  ;;  %v1101_v10 = vld [vmem:[#allocation16_spill] sm:$0xff] }
  0x57   :  { %705 = vmatprep.subr.bf16.mxu0 %v949_v12  ;;  %523 = vmatprep.mubr.bf16.mxu0 %v1012_v48 }
  0x58   :  { %483 = vmatmul.mubr.bf16.gmra.mrb[4].mxu1 %v199_v3 }
  0x59   :  { %732 = vmatpush3.bf16.msra.mxu1 %v946_v11  ;;  %572 = vmatprep.mubr.bf16.mxu1 %v1014_v54  ;;  %v1102_v11 = vld [vmem:[#allocation17_spill] sm:$0xff] }
  0x5a   :  { %733 = vmatprep.subr.bf16.mxu1 %v952_v13  ;;  %706 = vmatpush3.bf16.msra.mxu0 %v955_v14 }
  0x5b   :  { %707 = vmatprep.subr.bf16.mxu0 %v961_v16 }
  0x5d   :  { %734 = vmatpush3.bf16.msra.mxu1 %v958_v15 }
  0x5e   :  { %735 = vmatprep.subr.bf16.mxu1 %v964_v17  ;;  %708 = vmatpush3.bf16.msra.mxu0 %v967_v18 }
  0x5f   :  { %709 = vmatprep.subr.bf16.mxu0 %v973_v20 }
  0x61   :  { %736 = vmatpush3.bf16.msra.mxu1 %v970_v19 }
  0x62   :  { %737 = vmatprep.subr.bf16.mxu1 %v976_v21  ;;  %710 = vmatpush3.bf16.msra.mxu0 %v979_v22 }
  0x63   :  { %711 = vmatprep.subr.bf16.mxu0 %v985_v24 }
  0x65   :  { %738 = vmatpush3.bf16.msra.mxu1 %v982_v23 }
  0x66   :  { %739 = vmatprep.subr.bf16.mxu1 %v988_v25  ;;  %712 = vmatpush3.bf16.msra.mxu0 %v991_v26 }
  0x67   :  { %713 = vmatprep.subr.bf16.mxu0 %v1096_v5 }
  0x69   :  { %740 = vmatpush3.bf16.msra.mxu1 %v1097_v6 }
  0x6a   :  { %741 = vmatprep.subr.bf16.mxu1 %v1098_v7  ;;  %714 = vmatpush3.bf16.msra.mxu0 %v1099_v8 }
  0x6d   :  { %742 = vmatpush3.bf16.msra.mxu1 %v1100_v9  ;;  %524 = vmatmul.mubr.bf16.vlgmr.msra.gmra.mrb[8].mxu0 %v1101_v10 }
  0x6e   :  { %531 = vmatprep.mubr.bf16.mxu0 %v1026_v52 }
  0x70   :  { %573 = vmatmul.mubr.bf16.vlgmr.msra.gmra.mrb[8].mxu1 %v1102_v11 }
  0x71   :  { %580 = vmatprep.mubr.bf16.mxu1 %v160_v46 }
  0x75   :  { %532 = vmatmul.mubr.bf16.gmra.mrb[12].mxu0 %v157_v28 }
  0x78   :  { %581 = vmatmul.mubr.bf16.gmra.mrb[12].mxu1 %v159_v31 }
 0x11f   :  { %v659_v12 = vpop.f32.mrb[0].mxu0 }
 0x120   :  { %v660_v13 = vpop.f32.mrb[1].mxu0 }
 0x121   :  { %v661_v14 = vadd.f32 %v660_v13, %v659_v12  ;;  %v662_v15 = vpop.f32.mrb[2].mxu0 }
 0x122   :  { %v663_v17 = vpop.f32.mrb[3].mxu0 }
 0x123   :  { %v687_v16 = vpop.f32.mrb[0].mxu1  ;;  %v664_v19 = vadd.f32 %v663_v17, %v662_v15 }
 0x124   :  { %v688_v18 = vpop.f32.mrb[1].mxu1 }
 0x125   :  { %v689_v20 = vadd.f32 %v688_v18, %v687_v16  ;;  %v690_v21 = vpop.f32.mrb[2].mxu1 }
 0x126   :  { %v691_v22 = vpop.f32.mrb[3].mxu1 }
 0x127   :  { %v477_v23 = vadd.f32 %v689_v20, %v661_v14  ;;  %v692_v24 = vadd.f32 %v691_v22, %v690_v21  ;;  %v665_v26 = vpop.f32.mrb[4].mxu0 }
 0x128   :  { %v666_v54 = vpop.f32.mrb[5].mxu0 }
 0x129   :  { %v480_v25 = vadd.f32 %v692_v24, %v664_v19  ;;  %v667_v51 = vadd.f32 %v666_v54, %v665_v26  ;;  %v668_v52 = vpop.f32.mrb[6].mxu0 }
 0x12a   :  { %v669_v36 = vpop.f32.mrb[7].mxu0 }
 0x12b   :  { %v693_v48 = vpop.f32.mrb[4].mxu1  ;;  %v670_v39 = vadd.f32 %v669_v36, %v668_v52 }
 0x12c   :  { %v694_v28 = vpop.f32.mrb[5].mxu1 }
 0x12d   :  { %v695_v63 = vadd.f32 %v694_v28, %v693_v48  ;;  %v696_v0 = vpop.f32.mrb[6].mxu1 }
 0x12e   :  { %v697_v59 = vpop.f32.mrb[7].mxu1 }
 0x12f   :  { %v485_v60 = vadd.f32 %v695_v63, %v667_v51  ;;  %v698_v42 = vadd.f32 %v697_v59, %v696_v0 }
 0x131   :  { %v488_v44 = vadd.f32 %v698_v42, %v670_v39 }
 0x140   :  { %v715_v1 = vpop.f32.mrb[8].mxu0 }
 0x141   :  { %v716_v32 = vpop.f32.mrb[9].mxu0 }
 0x142   :  { %v717_v38 = vadd.f32 %v716_v32, %v715_v1  ;;  %v718_v49 = vpop.f32.mrb[10].mxu0 }
 0x143   :  { %v743_v50 = vpop.f32.mrb[8].mxu1  ;;  %v719_v35 = vpop.f32.mrb[11].mxu0 }
 0x144   :  { %v526_v37 = vadd.f32 %v717_v38, %v477_v23  ;;  %v744_v40 = vpop.f32.mrb[9].mxu1  ;;  %v720_v41 = vadd.f32 %v719_v35, %v718_v49 }
 0x145   :  { %v745_v43 = vadd.f32 %v744_v40, %v743_v50  ;;  %v746_v46 = vpop.f32.mrb[10].mxu1 }
 0x146   :  { %v529_v47 = vadd.f32 %v720_v41, %v480_v25  ;;  %v747_v57 = vpop.f32.mrb[11].mxu1 }
 0x147   :  { %v575_v58 = vadd.f32 %v745_v43, %v526_v37  ;;  %v748_v45 = vadd.f32 %v747_v57, %v746_v46 }
 0x148   :  { %v721_v31 = vpop.f32.mrb[12].mxu0 }
 0x149   :  { %589 = vst [vmem:[#allocation7] sm:$0xff] %v575_v58  ;;  %v578_v56 = vadd.f32 %v748_v45, %v529_v47  ;;  %v722_v61 = vpop.f32.mrb[13].mxu0 }
 0x14a   :  { %v723_v29 = vadd.f32 %v722_v61, %v721_v31  ;;  %v724_v62 = vpop.f32.mrb[14].mxu0 }
 0x14b   :  { %590 = vst [vmem:[#allocation7 + $0x8] sm:$0xff] %v578_v56  ;;  %v749_v33 = vpop.f32.mrb[12].mxu1  ;;  %v725_v30 = vpop.f32.mrb[15].mxu0 }
 0x14c   :  { %v534_v2 = vadd.f32 %v723_v29, %v485_v60  ;;  %v750_v4 = vpop.f32.mrb[13].mxu1  ;;  %v726_v34 = vadd.f32 %v725_v30, %v724_v62 }
 0x14d   :  { %v751_v53 = vadd.f32 %v750_v4, %v749_v33  ;;  %v752_v27 = vpop.f32.mrb[14].mxu1 }
 0x14e   :  { %v537_v55 = vadd.f32 %v726_v34, %v488_v44  ;;  %v753_v3 = vpop.f32.mrb[15].mxu1 }
 0x14f   :  { %v583_v5 = vadd.f32 %v751_v53, %v534_v2  ;;  %v754_v6 = vadd.f32 %v753_v3, %v752_v27 }
 0x151   :  { %591 = vst [vmem:[#allocation7 + $0x10] sm:$0xff] %v583_v5  ;;  %v586_v7 = vadd.f32 %v754_v6, %v537_v55 }
 0x153   :  { %592 = vst [vmem:[#allocation7 + $0x18] sm:$0xff] %v586_v7 }
 0x154   :  { %850 = shalt.err (!%p847_p6)
}
 0x155   :  { %s851_s11 = scalar_lea.hbm %s1081_s2, 512 }
 0x156   :  { %p852_p7 = scmp.ne.s32.totalorder %s1081_s2, %s851_s11  ;;  %p855_p8 = scmp.lt.u32.totalorder %s851_s11, %s1081_s2 }
 0x158   :  { %p857_p9 = pnand %p855_p8, %p852_p7 }
 0x15a   :  { %860 = shalt.err (!%p857_p9)
}
 0x15b   :  { %s873_s16 = smov 128   ;;  %s874_s17 = smov 8  }
 0x15c   :  { %604 = dma.vmem_to_hbm [thread:$0]  %s599_s7, 512, %s1081_s2, [#allocation4], %s873_s16, %s873_s16, %s874_s17  }
 0x15d   :  { %865 = dma.done.wait [#allocation4], 512  }
 0x15e   :  { %866 = vsyncadd [#allocation4], 4294966784 }
 0x15f   :  { %608 = vsyncpa [#allocation3], 1 }
 0x160   :  { %609 = vsyncpa [#allocation6], 1 }
 0x161   :  { %610 = vsyncpa [#allocation4], 1 }

</bundles_post_ra>
